<compile_context>
chip_gen: v7x
topology: tpu7x:2x2x1
jax: 0.10.0
libtpu: 0.0.40
codegen_flags: <defaults>
</compile_context>

<pallas_src>
import numpy as np
import jax
import jax.numpy as jnp
from jax.experimental import pallas as pl
from jax.experimental.pallas import tpu as pltpu

PATCH = 8     # patch size used by the synthetic patch-embed encoder
LANE = 128    # lane width: embedding dim is zero-padded to this for dense stores


# ----------------------------------------------------------------------------
# Pallas kernel: single invocation, both encoder branches back-to-back.
#   x*  : (N, C*H*W)    f32   flat chips (cast to bf16 in-kernel)
#   w1* : (C*H*W, NP*F) bf16  patchify folded into a dense matmul
#   b1* : (1, NP*F)     f32
#   w2* : (NP*F, 128)   bf16  mean-pool folded in; E zero-padded to 128 lanes
#   b2* : (1, 128)      f32   zero-padded
#   o*  : (N, 128)      f32   L2-normalized embeddings (pad columns stay 0)
# ----------------------------------------------------------------------------
def _fused_encoder_kernel(xc_ref, xf_ref,
                          w1c_ref, b1c_ref, w2c_ref, b2c_ref,
                          w1f_ref, b1f_ref, w2f_ref, b2f_ref,
                          oc_ref, of_ref):
    def branch(x_ref, w1_ref, b1_ref, w2_ref, b2_ref, o_ref):
        x = x_ref[...].astype(jnp.bfloat16)                       # cast hides under MXU
        h = jnp.dot(x, w1_ref[...], preferred_element_type=jnp.float32)
        h = jnp.maximum(h + b1_ref[...], 0.0)                     # bias + ReLU in f32
        e = jnp.dot(h.astype(jnp.bfloat16), w2_ref[...],
                    preferred_element_type=jnp.float32)
        e = e + b2_ref[...]
        inv = jax.lax.rsqrt(jnp.sum(e * e, axis=-1, keepdims=True) + 1e-12)
        o_ref[...] = (e * inv).astype(o_ref.dtype)

    branch(xc_ref, w1c_ref, b1c_ref, w2c_ref, b2c_ref, oc_ref)
    branch(xf_ref, w1f_ref, b1f_ref, w2f_ref, b2f_ref, of_ref)


def fused_aero_encode(xc, xf, w1c, b1c, w2c, b2c, w1f, b1f, w2f, b2f):
    """Run both encoder branches in one single-step pallas_call.

    xc: (Nc, D_img) f32 flat coarse chips (NCHW pixel order, already /255)
    xf: (Nf, D_img) f32 flat fine chips   (NHWC pixel order, raw 0-255)
    Returns (oc, of) with E padded to 128 lanes.
    """
    n_c, d_img = xc.shape
    n_f = xf.shape[0]
    hidden = w1c.shape[1]
    e_pad = w2c.shape[1]

    flops = int(2 * (n_c + n_f) * (d_img * hidden + hidden * e_pad))
    bytes_accessed = int(
        (n_c + n_f) * d_img * 4                        # activations in (f32)
        + 2 * (d_img * hidden + hidden * e_pad) * 2    # bf16 weights, both branches
        + 2 * (hidden + e_pad) * 4                     # f32 biases
        + (n_c + n_f) * e_pad * 4)                     # f32 outputs

    def vmem():
        return pl.BlockSpec(memory_space=pltpu.MemorySpace.VMEM)

    return pl.pallas_call(
        _fused_encoder_kernel,
        out_shape=(jax.ShapeDtypeStruct((n_c, e_pad), jnp.float32),
                   jax.ShapeDtypeStruct((n_f, e_pad), jnp.float32)),
        in_specs=[vmem() for _ in range(10)],
        out_specs=(vmem(), vmem()),
        cost_estimate=pl.CostEstimate(flops=flops,
                                      transcendentals=int(n_c + n_f),
                                      bytes_accessed=bytes_accessed),
    )(xc, xf, w1c, b1c, w2c, b2c, w1f, b1f, w2f, b2f)


# ----------------------------------------------------------------------------
# Host-side weight preparation: fold patchify + mean pooling into dense,
# lane-aligned matrices, pad the embedding to 128 lanes (one-time init cost).
# ----------------------------------------------------------------------------
def init_aero_bev_net(key, in_dim, feat_size, embedding_size):
    k1, k2, k3, k4 = jax.random.split(key, 4)
    w1 = jax.random.normal(k1, (in_dim, feat_size), jnp.float32) / np.sqrt(in_dim)
    b1 = 0.01 * jax.random.normal(k2, (1, feat_size), jnp.float32)
    w2 = jax.random.normal(k3, (feat_size, embedding_size), jnp.float32) / np.sqrt(feat_size)
    b2 = 0.01 * jax.random.normal(k4, (1, embedding_size), jnp.float32)
    return (w1, b1, w2, b2)


def _expand_patch_weights(w1, b1, w2, b2, layout, c, gh, gw, patch=PATCH, e_pad=LANE):
    """Build (C*H*W, NP*F) patch-embed weights for a given flat pixel order
    ('nchw' or 'nhwc'), a tiled bias (1, NP*F), a pooled head padded to
    (NP*F, e_pad) and a padded bias (1, e_pad)."""
    nph, npw = gh // patch, gw // patch
    npatches = nph * npw
    w1 = np.asarray(w1, np.float32)
    feat = w1.shape[1]
    big = np.zeros((c * gh * gw, npatches * feat), np.float32)
    for hi in range(gh):
        for wi in range(gw):
            for ci in range(c):
                if layout == "nchw":
                    flat = ci * gh * gw + hi * gw + wi
                else:  # nhwc
                    flat = hi * gw * c + wi * c + ci
                p = (hi // patch) * npw + (wi // patch)
                d = ci * patch * patch + (hi % patch) * patch + (wi % patch)
                big[flat, p * feat:(p + 1) * feat] = w1[d]
    b1_big = np.tile(np.asarray(b1, np.float32), (1, npatches))               # (1, NP*F)
    w2_pool = np.tile(np.asarray(w2, np.float32), (npatches, 1)) / npatches   # (NP*F, E)
    emb = w2_pool.shape[1]
    w2_pad = np.zeros((npatches * feat, e_pad), np.float32)
    w2_pad[:, :emb] = w2_pool
    b2_pad = np.zeros((1, e_pad), np.float32)
    b2_pad[:, :emb] = np.asarray(b2, np.float32)
    return big, b1_big, w2_pad, b2_pad


# ----------------------------------------------------------------------------
# One jitted device path: u8 cells -> /255 f32, reshapes, pallas kernel, slice.
# ----------------------------------------------------------------------------
def _make_device_forward(params, emb, gh, gw):
    w1c, b1c, w2c, b2c, w1f, b1f, w2f, b2f = params

    def fwd(cells_u8, aerial_imgs):
        n_c = cells_u8.shape[0]
        # matches reference: .permute(0,3,1,2).float()/255 (cells arrive NCHW u8)
        fine_map_cells = cells_u8.astype(jnp.float32) * (1.0 / 255.0)   # (Nc,3,gh,gw)
        xc = fine_map_cells.reshape(n_c, 3 * gh * gw)                   # NCHW flat
        # fine branch: NHWC flat (free reshape; raw 0-255 values, the reference
        # forward does NOT normalize aerial_imgs; the NCHW permute is folded
        # into the expanded fine weights).
        xf = aerial_imgs.astype(jnp.float32).reshape(-1, gh * gw * 3)
        oc, of = fused_aero_encode(xc, xf, w1c, b1c, w2c, b2c,
                                   w1f, b1f, w2f, b2f)
        return fine_map_cells, oc[:, :emb], of[:, :emb]

    return jax.jit(fwd)


# ----------------------------------------------------------------------------
# Pure-JAX reference encoder (f32, explicit patchify + mean pool) for checking.
# ----------------------------------------------------------------------------
def reference_encode_nchw(chips_nchw, params, patch=PATCH):
    w1, b1, w2, b2 = params
    n, c, gh, gw = chips_nchw.shape
    nph, npw = gh // patch, gw // patch
    p = chips_nchw.reshape(n, c, nph, patch, npw, patch).transpose(0, 2, 4, 1, 3, 5)
    p = p.reshape(n, nph * npw, c * patch * patch).astype(jnp.float32)
    h = jnp.maximum(jnp.einsum("npd,df->npf", p, w1) + b1, 0.0)
    f = jnp.mean(h, axis=1)
    e = f @ w2 + b2
    return e / jnp.sqrt(jnp.sum(e * e, axis=-1, keepdims=True) + 1e-12)


# ----------------------------------------------------------------------------
# Wrapper reproducing AeroBEVNetWrapper.forward semantics.
# ----------------------------------------------------------------------------
class AeroBEVNetWrapperPallas:
    def __init__(self, aerial_map, grid_size=(16, 16), crop_size=(48, 48),
                 feat_size=32, embedding_size=32,
                 origin=(0.0, 0.0), resolution=(1.0, 1.0), key=None):
        # keep the map on the host (cv2.imread-style numpy uint8, values 0..255)
        self.img = np.asarray(aerial_map)
        self.grid_size = grid_size
        self.crop_size = crop_size
        self.origin = np.asarray(origin, np.float64)
        self.resolution = np.asarray(resolution, np.float64)
        self.prior_loc = None
        self.embedding_size = embedding_size

        gh, gw = grid_size
        in_dim = 3 * PATCH * PATCH
        kc, kf = jax.random.split(key)
        # raw ("small") params kept for the pure-JAX reference
        self.coarse_raw = init_aero_bev_net(kc, in_dim, feat_size, embedding_size)
        self.fine_raw = init_aero_bev_net(kf, in_dim, feat_size, embedding_size)

        # expanded, MXU-ready params (built once): w1/w2 bf16, biases f32,
        # embedding zero-padded to 128 lanes.
        w1c, b1c, w2c, b2c = _expand_patch_weights(*self.coarse_raw, "nchw", 3, gh, gw)
        w1f, b1f, w2f, b2f = _expand_patch_weights(*self.fine_raw, "nhwc", 3, gh, gw)
        params = (jnp.asarray(w1c, jnp.bfloat16), jnp.asarray(b1c, jnp.float32),
                  jnp.asarray(w2c, jnp.bfloat16), jnp.asarray(b2c, jnp.float32),
                  jnp.asarray(w1f, jnp.bfloat16), jnp.asarray(b1f, jnp.float32),
                  jnp.asarray(w2f, jnp.bfloat16), jnp.asarray(b2f, jnp.float32))
        self._device_forward = _make_device_forward(params, embedding_size, gh, gw)

    # ---- coordinate plumbing (plain numpy glue) -----------------------------
    def set_prior_loc_east_north(self, en):
        self.prior_loc = en

    def gps_to_east_north(self, gps_loc):
        gps_loc = np.asarray(gps_loc, dtype=np.float64)
        if gps_loc.ndim == 1:
            gps_loc = gps_loc.reshape(1, -1)
        return np.abs(gps_loc)[:, 0], np.abs(gps_loc)[:, 1]

    def extract_img_locs_from_en(self, easting, northing):
        x = (np.asarray(easting, np.float64) - self.origin[0]) / self.resolution[0]
        y = (np.asarray(northing, np.float64) - self.origin[1]) / self.resolution[1]
        return x, y

    def extract_img_locs_from_gps(self, gps_loc):
        e, n = self.gps_to_east_north(gps_loc)
        return self.extract_img_locs_from_en(e, n)

    def extract_chip_from_en(self, easting, northing, yaw=0.0, mode='map',
                             override_size=None):
        # mode == 'map' -> yaw forced to 0 => warpAffine is identity => plain crop.
        x, y = self.extract_img_locs_from_en(easting, northing)
        size = np.array(override_size if override_size is not None else self.crop_size)
        half = size // 2
        y1 = int(np.round(float(y) - half[1]))
        y2 = int(np.round(float(y) + half[1]))
        x1 = int(np.round(float(x) - half[0]))
        x2 = int(np.round(float(x) + half[0]))
        return self.img[y1:y2, x1:x2, :]            # host numpy slice

    # ---- divide_fine_map_grid (host-vectorized cell extraction) -------------
    def divide_fine_map_grid(self, gps_locs, grid_size, padding, yaw_deg=0.0):
        prior_x, prior_y = self.extract_img_locs_from_en(self.prior_loc[0],
                                                         self.prior_loc[1])
        map_chip = self.extract_chip_from_en(self.prior_loc[0], self.prior_loc[1],
                                             yaw_deg, mode='map',
                                             override_size=self.crop_size)
        img_locs_x, img_locs_y = self.extract_img_locs_from_gps(np.asarray(gps_locs))
        dx = img_locs_x - float(prior_x)
        dy = img_locs_y - float(prior_y)
        gt_x = self.crop_size[0] // 2 + dx
        gt_y = self.crop_size[1] // 2 + dy
        gt_img_locs = np.stack((gt_x, gt_y)).T
        if np.any((gt_x < 0) | (gt_x >= self.crop_size[0]) |
                  (gt_y < 0) | (gt_y >= self.crop_size[1])):
            print('GROUND TRUTH IS OUT OF CHIP RANGE')

        gh, gw = grid_size
        H, W = map_chip.shape[0], map_chip.shape[1]
        is_ = [i for i in range(padding, H - padding - gh // 2, gh // 2) if i + gh <= H]
        js_ = [j for j in range(padding, W - padding - gw // 2, gw // 2) if j + gw <= W]
        if len(is_) == 0 or len(js_) == 0:
            return None, None, gt_img_locs

        # One strided-view gather instead of len(is_)*len(js_) device slices.
        # windows[i, j, c, a, b] == map_chip[i+a, j+b, c]  -> cells already NCHW.
        windows = np.lib.stride_tricks.sliding_window_view(map_chip, (gh, gw),
                                                           axis=(0, 1))
        cells_u8 = np.ascontiguousarray(
            windows[np.ix_(is_, js_)].reshape(-1, map_chip.shape[2], gh, gw))
        map_locs = np.array([[j + gw // 2, i + gh // 2] for i in is_ for j in js_],
                            np.int32)
        # uint8 cells stay on the host; the /255 + f32 cast runs on device
        # inside the single jitted forward (4x fewer H2D bytes).
        return cells_u8, jnp.asarray(map_locs), gt_img_locs

    # ---- forward -------------------------------------------------------------
    def forward(self, gps_locs, aerial_imgs, padding):
        cells_u8, map_locs, gt_map_locs = self.divide_fine_map_grid(
            gps_locs, self.grid_size, int(padding))
        fine_map_cells, general_cells, specific_cells = self._device_forward(
            cells_u8, aerial_imgs)
        return general_cells, specific_cells, fine_map_cells, map_locs, gt_map_locs


# ----------------------------------------------------------------------------
if __name__ == "__main__":
    key = jax.random.PRNGKey(0)
    k_img, k_aer, k_params = jax.random.split(key, 3)

    # deterministic synthetic aerial map ("cv2.imread" replacement), uint8 0..255
    H_MAP, W_MAP = 128, 128
    aerial_map = np.asarray(
        jax.random.uniform(k_img, (H_MAP, W_MAP, 3), jnp.float32, 0.0, 255.0)
    ).astype(np.uint8)

    grid_size = (16, 16)
    crop_size = (48, 48)
    wrapper = AeroBEVNetWrapperPallas(aerial_map,
                                      grid_size=grid_size,
                                      crop_size=crop_size,
                                      feat_size=32,
                                      embedding_size=32,
                                      key=k_params)
    # prior location at the center of the map (easting, northing)
    wrapper.set_prior_loc_east_north((64.0, 64.0))

    # small batch of GPS locations near the prior and aerial image chips
    B, NV = 2, 2
    gps_locs = np.array([[62.0, 63.0], [66.5, 65.0]], dtype=np.float64)
    aerial_imgs = jax.random.uniform(k_aer, (B, NV, grid_size[0], grid_size[1], 3),
                                     jnp.float32, 0.0, 255.0)

    (general_cells, specific_cells, fine_map_cells,
     map_locs, gt_map_locs) = wrapper.forward(gps_locs, aerial_imgs, padding=0)
    jax.block_until_ready((general_cells, specific_cells, fine_map_cells, map_locs))

    # 25 overlapping 16x16 cells from a 48x48 chip with stride 8, padding 0
    assert fine_map_cells.shape == (25, 3, 16, 16)
    assert general_cells.shape == (25, 32)
    assert specific_cells.shape == (B * NV, 32)
    assert map_locs.shape == (25, 2)
    assert gt_map_locs.shape == (B, 2)
    assert bool(jnp.all(jnp.isfinite(general_cells)))
    assert bool(jnp.all(jnp.isfinite(specific_cells)))

    # correctness check against a pure-JAX f32 reference (bf16 MXU operands ->
    # compare via cosine similarity of the normalized embeddings)
    ref_general = reference_encode_nchw(fine_map_cells, wrapper.coarse_raw)
    aerial_nchw = jnp.transpose(aerial_imgs, (0, 1, 4, 2, 3)).reshape(-1, 3, 16, 16)
    ref_specific = reference_encode_nchw(aerial_nchw, wrapper.fine_raw)

    def _cos(a, b):
        return jnp.sum(a * b, axis=-1) / (
            jnp.linalg.norm(a, axis=-1) * jnp.linalg.norm(b, axis=-1) + 1e-12)

    assert float(jnp.min(_cos(general_cells, ref_general))) > 0.98
    assert float(jnp.min(_cos(specific_cells, ref_specific))) > 0.98

    print("KERNEL_OK")
</pallas_src>

<mosaic_0001>
module attributes {stable_mosaic.version = 11 : i64} {
  func.func @_fused_encoder_kernel(%arg0: memref<25x768xf32, #tpu.memory_space<vmem>>, %arg1: memref<4x768xf32, #tpu.memory_space<vmem>>, %arg2: memref<768x128xbf16, #tpu.memory_space<vmem>>, %arg3: memref<1x128xf32, #tpu.memory_space<vmem>>, %arg4: memref<128x128xbf16, #tpu.memory_space<vmem>>, %arg5: memref<1x128xf32, #tpu.memory_space<vmem>>, %arg6: memref<768x128xbf16, #tpu.memory_space<vmem>>, %arg7: memref<1x128xf32, #tpu.memory_space<vmem>>, %arg8: memref<128x128xbf16, #tpu.memory_space<vmem>>, %arg9: memref<1x128xf32, #tpu.memory_space<vmem>>, %arg10: memref<25x128xf32, #tpu.memory_space<vmem>>, %arg11: memref<4x128xf32, #tpu.memory_space<vmem>>) attributes {dimension_semantics = [], scalar_prefetch = 0 : i64, scratch_operands = 0 : i64, tpu.core_type = #tpu.core_type<tc>} {
    %c0 = arith.constant 0 : index
    %c0_0 = arith.constant 0 : index
    %0 = vector.load %arg0[%c0, %c0_0] : memref<25x768xf32, #tpu.memory_space<vmem>>, vector<25x768xf32>
    %1 = arith.truncf %0 : vector<25x768xf32> to vector<25x768xbf16>
    %c0_1 = arith.constant 0 : index
    %c0_2 = arith.constant 0 : index
    %2 = vector.load %arg2[%c0_1, %c0_2] : memref<768x128xbf16, #tpu.memory_space<vmem>>, vector<768x128xbf16>
    %cst = arith.constant dense<0.000000e+00> : vector<25x128xf32>
    %3 = tpu.matmul %1, %2, %cst {dimension_numbers = #tpu.dot_dimension_numbers<[1], [0], [0], [1], [0, 0, 1, 1], [], []>} : vector<25x768xbf16>, vector<768x128xbf16>, vector<25x128xf32> -> vector<25x128xf32>
    %c0_3 = arith.constant 0 : index
    %c0_4 = arith.constant 0 : index
    %4 = vector.load %arg3[%c0_3, %c0_4] : memref<1x128xf32, #tpu.memory_space<vmem>>, vector<1x128xf32>
    %5 = vector.broadcast %4 : vector<1x128xf32> to vector<25x128xf32>
    %6 = arith.addf %3, %5 : vector<25x128xf32>
    %cst_5 = arith.constant 0.000000e+00 : f32
    %7 = vector.broadcast %cst_5 : f32 to vector<25x128xf32>
    %8 = arith.maximumf %6, %7 : vector<25x128xf32>
    %9 = arith.truncf %8 : vector<25x128xf32> to vector<25x128xbf16>
    %c0_6 = arith.constant 0 : index
    %c0_7 = arith.constant 0 : index
    %10 = vector.load %arg4[%c0_6, %c0_7] : memref<128x128xbf16, #tpu.memory_space<vmem>>, vector<128x128xbf16>
    %cst_8 = arith.constant dense<0.000000e+00> : vector<25x128xf32>
    %11 = tpu.matmul %9, %10, %cst_8 {dimension_numbers = #tpu.dot_dimension_numbers<[1], [0], [0], [1], [0, 0, 1, 1], [], []>} : vector<25x128xbf16>, vector<128x128xbf16>, vector<25x128xf32> -> vector<25x128xf32>
    %c0_9 = arith.constant 0 : index
    %c0_10 = arith.constant 0 : index
    %12 = vector.load %arg5[%c0_9, %c0_10] : memref<1x128xf32, #tpu.memory_space<vmem>>, vector<1x128xf32>
    %13 = vector.broadcast %12 : vector<1x128xf32> to vector<25x128xf32>
    %14 = arith.addf %11, %13 : vector<25x128xf32>
    %15 = arith.mulf %14, %14 : vector<25x128xf32>
    %cst_11 = arith.constant dense<0.000000e+00> : vector<25xf32>
    %16 = vector.multi_reduction <add>, %15, %cst_11 [1] : vector<25x128xf32> to vector<25xf32>
    %17 = vector.shape_cast %16 : vector<25xf32> to vector<25x1xf32>
    %cst_12 = arith.constant 9.99999996E-13 : f32
    %18 = vector.broadcast %cst_12 : f32 to vector<25x1xf32>
    %19 = arith.addf %17, %18 : vector<25x1xf32>
    %20 = math.rsqrt %19 : vector<25x1xf32>
    %21 = vector.broadcast %20 : vector<25x1xf32> to vector<25x128xf32>
    %22 = arith.mulf %14, %21 : vector<25x128xf32>
    %c0_13 = arith.constant 0 : index
    %c0_14 = arith.constant 0 : index
    %23 = vector.load %arg10[%c0_13, %c0_14] : memref<25x128xf32, #tpu.memory_space<vmem>>, vector<25x128xf32>
    tpu.vector_store %arg10[%c0_13, %c0_14], %22 {strides = array<i32>} : memref<25x128xf32, #tpu.memory_space<vmem>>, vector<25x128xf32>,
    %c0_15 = arith.constant 0 : index
    %c0_16 = arith.constant 0 : index
    %24 = vector.load %arg1[%c0_15, %c0_16] : memref<4x768xf32, #tpu.memory_space<vmem>>, vector<4x768xf32>
    %25 = arith.truncf %24 : vector<4x768xf32> to vector<4x768xbf16>
    %c0_17 = arith.constant 0 : index
    %c0_18 = arith.constant 0 : index
    %26 = vector.load %arg6[%c0_17, %c0_18] : memref<768x128xbf16, #tpu.memory_space<vmem>>, vector<768x128xbf16>
    %cst_19 = arith.constant dense<0.000000e+00> : vector<4x128xf32>
    %27 = tpu.matmul %25, %26, %cst_19 {dimension_numbers = #tpu.dot_dimension_numbers<[1], [0], [0], [1], [0, 0, 1, 1], [], []>} : vector<4x768xbf16>, vector<768x128xbf16>, vector<4x128xf32> -> vector<4x128xf32>
    %c0_20 = arith.constant 0 : index
    %c0_21 = arith.constant 0 : index
    %28 = vector.load %arg7[%c0_20, %c0_21] : memref<1x128xf32, #tpu.memory_space<vmem>>, vector<1x128xf32>
    %29 = vector.broadcast %28 : vector<1x128xf32> to vector<4x128xf32>
    %30 = arith.addf %27, %29 : vector<4x128xf32>
    %cst_22 = arith.constant 0.000000e+00 : f32
    %31 = vector.broadcast %cst_22 : f32 to vector<4x128xf32>
    %32 = arith.maximumf %30, %31 : vector<4x128xf32>
    %33 = arith.truncf %32 : vector<4x128xf32> to vector<4x128xbf16>
    %c0_23 = arith.constant 0 : index
    %c0_24 = arith.constant 0 : index
    %34 = vector.load %arg8[%c0_23, %c0_24] : memref<128x128xbf16, #tpu.memory_space<vmem>>, vector<128x128xbf16>
    %cst_25 = arith.constant dense<0.000000e+00> : vector<4x128xf32>
    %35 = tpu.matmul %33, %34, %cst_25 {dimension_numbers = #tpu.dot_dimension_numbers<[1], [0], [0], [1], [0, 0, 1, 1], [], []>} : vector<4x128xbf16>, vector<128x128xbf16>, vector<4x128xf32> -> vector<4x128xf32>
    %c0_26 = arith.constant 0 : index
    %c0_27 = arith.constant 0 : index
    %36 = vector.load %arg9[%c0_26, %c0_27] : memref<1x128xf32, #tpu.memory_space<vmem>>, vector<1x128xf32>
    %37 = vector.broadcast %36 : vector<1x128xf32> to vector<4x128xf32>
    %38 = arith.addf %35, %37 : vector<4x128xf32>
    %39 = arith.mulf %38, %38 : vector<4x128xf32>
    %cst_28 = arith.constant dense<0.000000e+00> : vector<4xf32>
    %40 = vector.multi_reduction <add>, %39, %cst_28 [1] : vector<4x128xf32> to vector<4xf32>
    %41 = vector.shape_cast %40 : vector<4xf32> to vector<4x1xf32>
    %cst_29 = arith.constant 9.99999996E-13 : f32
    %42 = vector.broadcast %cst_29 : f32 to vector<4x1xf32>
    %43 = arith.addf %41, %42 : vector<4x1xf32>
    %44 = math.rsqrt %43 : vector<4x1xf32>
    %45 = vector.broadcast %44 : vector<4x1xf32> to vector<4x128xf32>
    %46 = arith.mulf %38, %45 : vector<4x128xf32>
    %c0_30 = arith.constant 0 : index
    %c0_31 = arith.constant 0 : index
    %47 = vector.load %arg11[%c0_30, %c0_31] : memref<4x128xf32, #tpu.memory_space<vmem>>, vector<4x128xf32>
    tpu.vector_store %arg11[%c0_30, %c0_31], %46 {strides = array<i32>} : memref<4x128xf32, #tpu.memory_space<vmem>>, vector<4x128xf32>,
    return
  }
}

</mosaic_0001>

<bundles_post_ra>
// kernel: fwd.1
= control target key start
LH: loop header
LB: loop body
LE: loop exit
PB: predicated region body
PF: predicated region fallthrough
CT: control target
= control target key end

     0   :  { %17 = vsyncpa [#allocation3], 0  ;;  %s2474_s0 = inlined_call_operand.vmem [shape: f32[25,768], index: 0, kind: input, shape index: {}]   ;;  %s2475_s1 = inlined_call_operand.vmem [shape: f32[4,768], index: 1, kind: input, shape index: {}]   ;;  %s2476_s2 = inlined_call_operand.vmem [shape: bf16[768,128], index: 2, kind: input, shape index: {}]   ;;  %s2477_s3 = inlined_call_operand.vmem [shape: f32[1,128], index: 3, kind: input, shape index: {}]   ;;  %s2478_s4 = inlined_call_operand.vmem [shape: bf16[128,128], index: 4, kind: input, shape index: {}]   ;;  %s2479_s5 = inlined_call_operand.vmem [shape: f32[1,128], index: 5, kind: input, shape index: {}]   ;;  %s2480_s6 = inlined_call_operand.vmem [shape: bf16[768,128], index: 6, kind: input, shape index: {}]   ;;  %s2481_s7 = inlined_call_operand.vmem [shape: f32[1,128], index: 7, kind: input, shape index: {}]   ;;  %s2482_s8 = inlined_call_operand.vmem [shape: bf16[128,128], index: 8, kind: input, shape index: {}]   ;;  %s2483_s9 = inlined_call_operand.vmem [shape: f32[1,128], index: 9, kind: input, shape index: {}]   ;;  %s2484_s10 = inlined_call_operand.hbm [shape: f32[25,128], index: 10, kind: output, shape index: {0}]   ;;  %s2485_s11 = inlined_call_operand.hbm [shape: f32[4,128], index: 11, kind: output, shape index: {1}]  }
   0x1   :  { %v1782_v0 = vld [vmem:[%s2476_s2 + $0x40] sm:$0xff]   ;;  %v1786_v4 = vld [vmem:[%s2476_s2 + $0x48] sm:$0xff]   ;;  %v1790_v8 = vld [vmem:[%s2476_s2 + $0x50] sm:$0xff]  }
   0x2   :  { %v1783_v1 = vld [vmem:[%s2476_s2] sm:$0xff]   ;;  %1567 = vmatprep.subr.bf16.mxu0 %v1782_v0  ;;  %v1787_v5 = vld [vmem:[%s2476_s2 + $0x8] sm:$0xff]   ;;  %v1791_v9 = vld [vmem:[%s2476_s2 + $0x10] sm:$0xff]  }
   0x3   :  { %v1784_v2 = vld [vmem:[%s2476_s2 + $0xc0] sm:$0xff]   ;;  %1568 = vmatpush3.bf16.msra.mxu0 %v1783_v1  ;;  %v1788_v6 = vld [vmem:[%s2476_s2 + $0xc8] sm:$0xff]   ;;  %v1792_v10 = vld [vmem:[%s2476_s2 + $0xd0] sm:$0xff]  }
   0x4   :  { %v1785_v3 = vld [vmem:[%s2476_s2 + $0x80] sm:$0xff]   ;;  %1595 = vmatprep.subr.bf16.mxu1 %v1784_v2  ;;  %1569 = vmatprep.subr.bf16.mxu0 %v1786_v4  ;;  %v1789_v7 = vld [vmem:[%s2476_s2 + $0x88] sm:$0xff]   ;;  %v1793_v11 = vld [vmem:[%s2476_s2 + $0x90] sm:$0xff]  }
   0x5   :  { %1596 = vmatpush3.bf16.msra.mxu1 %v1785_v3  ;;  %v1794_v12 = vld [vmem:[%s2476_s2 + $0x58] sm:$0xff]   ;;  %v1798_v16 = vld [vmem:[%s2476_s2 + $0x60] sm:$0xff]   ;;  %v1802_v20 = vld [vmem:[%s2476_s2 + $0x68] sm:$0xff]  }
   0x6   :  { %1597 = vmatprep.subr.bf16.mxu1 %v1788_v6  ;;  %v1795_v13 = vld [vmem:[%s2476_s2 + $0x18] sm:$0xff]   ;;  %v1799_v17 = vld [vmem:[%s2476_s2 + $0x20] sm:$0xff]   ;;  %v1803_v21 = vld [vmem:[%s2476_s2 + $0x28] sm:$0xff]  }
   0x7   :  { %1570 = vmatpush3.bf16.msra.mxu0 %v1787_v5  ;;  %v1796_v14 = vld [vmem:[%s2476_s2 + $0xd8] sm:$0xff]   ;;  %v1800_v18 = vld [vmem:[%s2476_s2 + $0xe0] sm:$0xff]   ;;  %v1804_v22 = vld [vmem:[%s2476_s2 + $0xe8] sm:$0xff]  }
   0x8   :  { %1571 = vmatprep.subr.bf16.mxu0 %v1790_v8  ;;  %v1797_v15 = vld [vmem:[%s2476_s2 + $0x98] sm:$0xff]   ;;  %v1801_v19 = vld [vmem:[%s2476_s2 + $0xa0] sm:$0xff]   ;;  %v1805_v23 = vld [vmem:[%s2476_s2 + $0xa8] sm:$0xff]  }
   0x9   :  { %1598 = vmatpush3.bf16.msra.mxu1 %v1789_v7  ;;  %v1806_v24 = vld [vmem:[%s2476_s2 + $0x70] sm:$0xff]   ;;  %v1810_v28 = vld [vmem:[%s2476_s2 + $0x78] sm:$0xff]   ;;  %v41_v31 = vld [vmem:[%s2474_s0 + $0x8] sm:$0xff] }
   0xa   :  { %1599 = vmatprep.subr.bf16.mxu1 %v1792_v10  ;;  %v1807_v25 = vld [vmem:[%s2476_s2 + $0x30] sm:$0xff]   ;;  %v1811_v29 = vld [vmem:[%s2476_s2 + $0x38] sm:$0xff]   ;;  %v40_v35 = vld [vmem:[%s2474_s0] sm:$0xff] }
   0xb   :  { %1572 = vmatpush3.bf16.msra.mxu0 %v1791_v9  ;;  %v1808_v26 = vld [vmem:[%s2476_s2 + $0xf0] sm:$0xff]   ;;  %v1812_v30 = vld [vmem:[%s2476_s2 + $0xf8] sm:$0xff]   ;;  %v1814_v38 = vld [vmem:[%s2476_s2 + $0x140] sm:$0xff]  }
   0xc   :  { %1573 = vmatprep.subr.bf16.mxu0 %v1794_v12  ;;  %v1809_v27 = vld [vmem:[%s2476_s2 + $0xb0] sm:$0xff]   ;;  %v47_v32 = vld [vmem:[%s2474_s0 + $0x38] sm:$0xff]  ;;  %v49_v40 = vld [vmem:[%s2474_s0 + $0x48] sm:$0xff] }
   0xd   :  { %1600 = vmatpush3.bf16.msra.mxu1 %v1793_v11  ;;  %v65_v33 = vpack.c.bf16 %v47_v32, %v41_v31  ;;  %v1813_v34 = vld [vmem:[%s2476_s2 + $0xb8] sm:$0xff]   ;;  %v46_v36 = vld [vmem:[%s2474_s0 + $0x30] sm:$0xff]  ;;  %v1815_v42 = vld [vmem:[%s2476_s2 + $0x100] sm:$0xff]  }
   0xe   :  { %1601 = vmatprep.subr.bf16.mxu1 %v1796_v14  ;;  %v64_v37 = vpack.c.bf16 %v46_v36, %v40_v35  ;;  %v43_v39 = vld [vmem:[%s2474_s0 + $0x18] sm:$0xff]  ;;  %v42_v43 = vld [vmem:[%s2474_s0 + $0x10] sm:$0xff]  ;;  %v48_v44 = vld [vmem:[%s2474_s0 + $0x40] sm:$0xff] }
   0xf   :  { %1574 = vmatpush3.bf16.msra.mxu0 %v1795_v13  ;;  %499 = vmatprep.mubr.bf16.mxu0 %v65_v33  ;;  %v67_v41 = vpack.c.bf16 %v49_v40, %v43_v39  ;;  %v66_v45 = vpack.c.bf16 %v48_v44, %v42_v43  ;;  %v1816_v46 = vld [vmem:[%s2476_s2 + $0x148] sm:$0xff]   ;;  %v1818_v48 = vld [vmem:[%s2476_s2 + $0x150] sm:$0xff]   ;;  %v1820_v50 = vld [vmem:[%s2476_s2 + $0x158] sm:$0xff]  }
  0x10   :  { %1575 = vmatprep.subr.bf16.mxu0 %v1798_v16  ;;  %v1817_v47 = vld [vmem:[%s2476_s2 + $0x108] sm:$0xff]   ;;  %v1819_v49 = vld [vmem:[%s2476_s2 + $0x110] sm:$0xff]   ;;  %v1821_v51 = vld [vmem:[%s2476_s2 + $0x118] sm:$0xff]  }
  0x11   :  { %1602 = vmatpush3.bf16.msra.mxu1 %v1797_v15  ;;  %548 = vmatprep.mubr.bf16.mxu1 %v67_v41  ;;  %v53_v52 = vld [vmem:[%s2474_s0 + $0x68] sm:$0xff]  ;;  %v59_v53 = vld [vmem:[%s2474_s0 + $0x98] sm:$0x1]  ;;  %v1822_v54 = vld [vmem:[%s2476_s2 + $0x160] sm:$0xff]  }
  0x12   :  { %1603 = vmatprep.subr.bf16.mxu1 %v1800_v18  ;;  %v71_v55 = vpack.c.bf16 %v59_v53, %v53_v52  ;;  %v52_v56 = vld [vmem:[%s2474_s0 + $0x60] sm:$0xff]  ;;  %v58_v57 = vld [vmem:[%s2474_s0 + $0x90] sm:$0x1]  ;;  %v55_v60 = vld [vmem:[%s2474_s0 + $0x78] sm:$0xff] }
  0x13   :  { %1576 = vmatpush3.bf16.msra.mxu0 %v1799_v17  ;;  %v1823_v58 = vld [vmem:[%s2476_s2 + $0x120] sm:$0xff]   ;;  %v70_v59 = vpack.c.bf16 %v58_v57, %v52_v56  ;;  %v61_v61 = vld [vmem:[%s2474_s0 + $0xa8] sm:$0x1]  ;;  %v54_v62 = vld [vmem:[%s2474_s0 + $0x70] sm:$0xff] }
  0x14   :  { %1577 = vmatprep.subr.bf16.mxu0 %v1802_v20  ;;  %v73_v63 = vpack.c.bf16 %v61_v61, %v55_v60  ;;  %v60_v0 = vld [vmem:[%s2474_s0 + $0xa0] sm:$0x1]  ;;  %v1824_v1 = vld [vmem:[%s2476_s2 + $0x168] sm:$0xff]   ;;  %v51_v5 = vld [vmem:[%s2474_s0 + $0x58] sm:$0xff] }
  0x15   :  { %1604 = vmatpush3.bf16.msra.mxu1 %v1801_v19  ;;  %v72_v2 = vpack.c.bf16 %v60_v0, %v54_v62  ;;  %v1825_v3 = vld [vmem:[%s2476_s2 + $0x128] sm:$0xff]   ;;  %v1826_v6 = vld [vmem:[%s2476_s2 + $0x170] sm:$0xff]   ;;  %v1828_v9 = vld [vmem:[%s2476_s2 + $0x178] sm:$0xff]  }
  0x16   :  { %1605 = vmatprep.subr.bf16.mxu1 %v1804_v22  ;;  %v45_v4 = vld [vmem:[%s2474_s0 + $0x28] sm:$0xff]  ;;  %v1827_v8 = vld [vmem:[%s2476_s2 + $0x130] sm:$0xff]   ;;  %v1829_v10 = vld [vmem:[%s2476_s2 + $0x138] sm:$0xff]  }
  0x17   :  { %1578 = vmatpush3.bf16.msra.mxu0 %v1803_v21  ;;  %v69_v7 = vpack.c.bf16 %v51_v5, %v45_v4  ;;  %v44_v11 = vld [vmem:[%s2474_s0 + $0x20] sm:$0xff]  ;;  %v50_v12 = vld [vmem:[%s2474_s0 + $0x50] sm:$0xff]  ;;  %v57_v13 = vld [vmem:[%s2474_s0 + $0x88] sm:$0xff] }
  0x18   :  { %1579 = vmatprep.subr.bf16.mxu0 %v1806_v24  ;;  %v63_v14 = vld [vmem:[%s2474_s0 + $0xb8] sm:$0x1]  ;;  %v68_v15 = vpack.c.bf16 %v50_v12, %v44_v11  ;;  %v56_v17 = vld [vmem:[%s2474_s0 + $0x80] sm:$0xff]  ;;  %v62_v18 = vld [vmem:[%s2474_s0 + $0xb0] sm:$0x1] }
  0x19   :  { %1606 = vmatpush3.bf16.msra.mxu1 %v1805_v23  ;;  %v75_v16 = vpack.c.bf16 %v63_v14, %v57_v13  ;;  %v74_v19 = vpack.c.bf16 %v62_v18, %v56_v17 }
  0x1a   :  { %1607 = vmatprep.subr.bf16.mxu1 %v1808_v26 }
  0x1b   :  { %1580 = vmatpush3.bf16.msra.mxu0 %v1807_v25 }
  0x1c   :  { %1581 = vmatprep.subr.bf16.mxu0 %v1810_v28 }
  0x1d   :  { %1608 = vmatpush3.bf16.msra.mxu1 %v1809_v27 }
  0x1e   :  { %1609 = vmatprep.subr.bf16.mxu1 %v1812_v30 }
  0x1f   :  { %1582 = vmatpush3.bf16.msra.mxu0 %v1811_v29 }
  0x20   :  { %1623 = vmatprep.subr.bf16.mxu0 %v1814_v38 }
  0x21   :  { %1610 = vmatpush3.bf16.msra.mxu1 %v1813_v34 }
  0x22   :  { %500 = vmatmul.mubr.bf16.vlgmr.msra.gmra.mrb[0].mxu0 %v64_v37 }
  0x23   :  { %1624 = vmatpush3.bf16.msra.mxu0 %v1815_v42  ;;  %507 = vmatprep.mubr.bf16.mxu0 %v71_v55 }
  0x24   :  { %549 = vmatmul.mubr.bf16.vlgmr.msra.gmra.mrb[0].mxu1 %v66_v45  ;;  %1625 = vmatprep.subr.bf16.mxu0 %v1816_v46 }
  0x25   :  { %556 = vmatprep.mubr.bf16.mxu1 %v73_v63 }
  0x27   :  { %1626 = vmatpush3.bf16.msra.mxu0 %v1817_v47 }
  0x28   :  { %1627 = vmatprep.subr.bf16.mxu0 %v1818_v48 }
  0x2a   :  { %508 = vmatmul.mubr.bf16.gmra.mrb[4].mxu0 %v70_v59 }
  0x2b   :  { %1628 = vmatpush3.bf16.msra.mxu0 %v1819_v49  ;;  %597 = vmatprep.mubr.bf16.mxu0 %v69_v7 }
  0x2c   :  { %1629 = vmatprep.subr.bf16.mxu0 %v1820_v50  ;;  %557 = vmatmul.mubr.bf16.gmra.mrb[4].mxu1 %v72_v2 }
  0x2f   :  { %1630 = vmatpush3.bf16.msra.mxu0 %v1821_v51 }
  0x30   :  { %1631 = vmatprep.subr.bf16.mxu0 %v1822_v54 }
  0x33   :  { %1632 = vmatpush3.bf16.msra.mxu0 %v1823_v58 }
  0x34   :  { %1633 = vmatprep.subr.bf16.mxu0 %v1824_v1 }
  0x37   :  { %1634 = vmatpush3.bf16.msra.mxu0 %v1825_v3 }
  0x38   :  { %1635 = vmatprep.subr.bf16.mxu0 %v1826_v6 }
  0x3b   :  { %1636 = vmatpush3.bf16.msra.mxu0 %v1827_v8 }
  0x3c   :  { %1637 = vmatprep.subr.bf16.mxu0 %v1828_v9 }
  0x3f   :  { %1638 = vmatpush3.bf16.msra.mxu0 %v1829_v10 }
  0x42   :  { %598 = vmatmul.mubr.bf16.vlgmr.msra.gmra.mrb[8].mxu0 %v68_v15 }
  0x43   :  { %605 = vmatprep.mubr.bf16.mxu0 %v75_v16 }
  0x4a   :  { %606 = vmatmul.mubr.bf16.gmra.mrb[12].mxu0 %v74_v19 }
  0x4b   :  { %18 = vsyncpa [#allocation5], 0  ;;  %v1830_v20 = vld [vmem:[%s2480_s6 + $0x40] sm:$0xff]   ;;  %v1833_v23 = vld [vmem:[%s2480_s6 + $0x48] sm:$0xff]   ;;  %vm1956_vm0 = vmmov 0   ;;  %vm750_vm1 = vcmask 1040384  }
  0x4c   :  { %v1831_v21 = vld [vmem:[%s2478_s4] sm:$0xff]   ;;  %1661 = vmatprep.subr.bf16.mxu0 %v1830_v20  ;;  %v1834_v24 = vld [vmem:[%s2478_s4 + $0x8] sm:$0xff]   ;;  %v1836_v26 = vld [vmem:[%s2480_s6 + $0x50] sm:$0xff]   ;;  %vm1413_vm2 = vcmask 1043456   ;;  %s1957_s30 = smov [#allocation2]  }
  0x4d   :  { %v1832_v22 = vld [vmem:[%s2480_s6] sm:$0xff]   ;;  %1736 = vmatprep.subr.bf16.mxu1 %v1831_v21  ;;  %v1835_v25 = vld [vmem:[%s2480_s6 + $0x8] sm:$0xff]   ;;  %v1837_v27 = vld [vmem:[%s2478_s4 + $0x10] sm:$0xff]   ;;  %s1426_s12 = sshll.u32 %s1957_s30, 4  ;;  %s1427_s12 = int_to_ptr.vmem [resolvable:$true] %s1426_s12 }
  0x4e   :  { %1662 = vmatpush3.bf16.msra.mxu0 %v1832_v22  ;;  %1737 = vmatpush3.bf16.msra.mxu1 %v1831_v21  ;;  %v1838_v28 = vld [vmem:[%s2480_s6 + $0x10] sm:$0xff]   ;;  %v1839_v29 = vld [vmem:[%s2480_s6 + $0x58] sm:$0xff]   ;;  %v1842_v32 = vld [vmem:[%s2480_s6 + $0x60] sm:$0xff]   ;;  %s1907_s13 = scalar_lea.vmem %s1427_s12, 512  ;;  %p1912_p1 = scmp.lt.s32.totalorder %s1427_s12, %s1427_s12 }
  0x4f   :  { %1663 = vmatprep.subr.bf16.mxu0 %v1833_v23  ;;  %1738 = vmatprep.subr.bf16.mxu1 %v1834_v24  ;;  %v1840_v30 = vld [vmem:[%s2478_s4 + $0x18] sm:$0xff]   ;;  %v1843_v33 = vld [vmem:[%s2478_s4 + $0x20] sm:$0xff]   ;;  %v1845_v35 = vld [vmem:[%s2480_s6 + $0x68] sm:$0xff]   ;;  %p1908_p0 = scmp.ne.s32.totalorder %s1427_s12, %s1907_s13  ;;  %p1913_p2 = scmp.lt.s32.totalorder %s1907_s13, %s1907_s13 }
  0x50   :  { %v1841_v31 = vld [vmem:[%s2480_s6 + $0x18] sm:$0xff]   ;;  %v1844_v34 = vld [vmem:[%s2480_s6 + $0x20] sm:$0xff]   ;;  %v1846_v36 = vld [vmem:[%s2478_s4 + $0x28] sm:$0xff]  }
  0x51   :  { %v1847_v37 = vld [vmem:[%s2480_s6 + $0x28] sm:$0xff]   ;;  %v1848_v38 = vld [vmem:[%s2480_s6 + $0x70] sm:$0xff]   ;;  %v1851_v41 = vld [vmem:[%s2480_s6 + $0x78] sm:$0xff]   ;;  %p1914_p3 = por %p1913_p2, %p1912_p1 }
  0x52   :  { %1664 = vmatpush3.bf16.msra.mxu0 %v1835_v25  ;;  %1739 = vmatpush3.bf16.msra.mxu1 %v1834_v24  ;;  %v1849_v39 = vld [vmem:[%s2478_s4 + $0x30] sm:$0xff]   ;;  %v1852_v42 = vld [vmem:[%s2478_s4 + $0x38] sm:$0xff]   ;;  %v770_v44 = vld [vmem:[%s2475_s1] sm:$0xff] }
  0x53   :  { %1665 = vmatprep.subr.bf16.mxu0 %v1836_v26  ;;  %1740 = vmatprep.subr.bf16.mxu1 %v1837_v27  ;;  %v1850_v40 = vld [vmem:[%s2480_s6 + $0x30] sm:$0xff]   ;;  %v1853_v43 = vld [vmem:[%s2480_s6 + $0x38] sm:$0xff]   ;;  %v776_v45 = vcombine.high %v770_v44, %v770_v44  ;;  %v1855_v47 = vld [vmem:[%s2480_s6 + $0x140] sm:$0xff]   ;;  %v782_v48 = vpack.c.bf16 %v770_v44, %v770_v44  ;;  %p1915_p4 = pnand %p1914_p3, %p1908_p0 }
  0x54   :  { %v1856_v49 = vld [vmem:[%s2480_s6 + $0xc0] sm:$0xff]   ;;  %v1859_v51 = vld [vmem:[%s2480_s6 + $0x148] sm:$0xff]   ;;  %v1863_v53 = vld [vmem:[%s2480_s6 + $0x150] sm:$0xff]  }
  0x55   :  { %v783_v46 = vpack.c.bf16 %v776_v45, %v776_v45  ;;  %v1857_v50 = vld [vmem:[%s2480_s6 + $0x100] sm:$0xff]   ;;  %v1861_v52 = vld [vmem:[%s2480_s6 + $0x108] sm:$0xff]   ;;  %v1865_v54 = vld [vmem:[%s2480_s6 + $0x110] sm:$0xff]  }
  0x56   :  { %1666 = vmatpush3.bf16.msra.mxu0 %v1838_v28  ;;  %1741 = vmatpush3.bf16.msra.mxu1 %v1837_v27  ;;  %v1867_v55 = vld [vmem:[%s2480_s6 + $0x158] sm:$0xff]   ;;  %v1871_v57 = vld [vmem:[%s2480_s6 + $0x160] sm:$0xff]   ;;  %v1875_v59 = vld [vmem:[%s2480_s6 + $0x168] sm:$0xff]  }
  0x57   :  { %1667 = vmatprep.subr.bf16.mxu0 %v1839_v29  ;;  %1742 = vmatprep.subr.bf16.mxu1 %v1840_v30  ;;  %v1869_v56 = vld [vmem:[%s2480_s6 + $0x118] sm:$0xff]   ;;  %v1873_v58 = vld [vmem:[%s2480_s6 + $0x120] sm:$0xff]   ;;  %v1877_v60 = vld [vmem:[%s2480_s6 + $0x128] sm:$0xff]  }
  0x58   :  { %1211 = vmatprep.mubr.bf16.mxu0 %v783_v46  ;;  %v1879_v61 = vld [vmem:[%s2480_s6 + $0x170] sm:$0xff]   ;;  %v1883_v63 = vld [vmem:[%s2480_s6 + $0x178] sm:$0xff]   ;;  %v1451_v6 = vld [vmem:[%s2477_s3] ss:$0 sm:$0xff] }
  0x59   :  { %v1881_v62 = vld [vmem:[%s2480_s6 + $0x130] sm:$0xff]   ;;  %v1885_v1 = vld [vmem:[%s2480_s6 + $0x138] sm:$0xff]  }
  0x5a   :  { %1668 = vmatpush3.bf16.msra.mxu0 %v1841_v31  ;;  %1743 = vmatpush3.bf16.msra.mxu1 %v1840_v30  ;;  %v772_v0 = vld [vmem:[%s2475_s1 + $0x10] sm:$0xff] }
  0x5b   :  { %1669 = vmatprep.subr.bf16.mxu0 %v1842_v32  ;;  %1744 = vmatprep.subr.bf16.mxu1 %v1843_v33  ;;  %v778_v2 = vcombine.high %v772_v0, %v772_v0  ;;  %v786_v4 = vpack.c.bf16 %v772_v0, %v772_v0  ;;  %v1860_v0 = vld [vmem:[%s2480_s6 + $0xc8] sm:$0xff]  }
  0x5d   :  { %v787_v3 = vpack.c.bf16 %v778_v2, %v778_v2  ;;  %v1864_v2 = vld [vmem:[%s2480_s6 + $0xd0] sm:$0xff]  }
  0x5e   :  { %1670 = vmatpush3.bf16.msra.mxu0 %v1844_v34  ;;  %1745 = vmatpush3.bf16.msra.mxu1 %v1843_v33 }
  0x5f   :  { %1671 = vmatprep.subr.bf16.mxu0 %v1845_v35  ;;  %1746 = vmatprep.subr.bf16.mxu1 %v1846_v36 }
  0x62   :  { %1672 = vmatpush3.bf16.msra.mxu0 %v1847_v37  ;;  %1747 = vmatpush3.bf16.msra.mxu1 %v1846_v36 }
  0x63   :  { %1673 = vmatprep.subr.bf16.mxu0 %v1848_v38  ;;  %1748 = vmatprep.subr.bf16.mxu1 %v1849_v39 }
  0x66   :  { %1674 = vmatpush3.bf16.msra.mxu0 %v1850_v40  ;;  %1749 = vmatpush3.bf16.msra.mxu1 %v1849_v39 }
  0x67   :  { %1675 = vmatprep.subr.bf16.mxu0 %v1851_v41  ;;  %1750 = vmatprep.subr.bf16.mxu1 %v1852_v42 }
  0x6a   :  { %1676 = vmatpush3.bf16.msra.mxu0 %v1853_v43  ;;  %1751 = vmatpush3.bf16.msra.mxu1 %v1852_v42 }
  0x6b   :  { %1705 = vmatprep.subr.bf16.mxu0 %v1855_v47  ;;  %1683 = vmatprep.subr.bf16.mxu1 %v1856_v49 }
  0x6d   :  { %1212 = vmatmul.mubr.bf16.vlgmr.msra.gmra.mrb[16].mxu0 %v782_v48 }
  0x6e   :  { %1706 = vmatpush3.bf16.msra.mxu0 %v1857_v50  ;;  %1291 = vmatprep.mubr.bf16.mxu0 %v787_v3  ;;  %v1866_v3 = vld [vmem:[%s2480_s6 + $0x90] sm:$0xff]  }
  0x6f   :  { %1707 = vmatprep.subr.bf16.mxu0 %v1859_v51 }
  0x72   :  { %1708 = vmatpush3.bf16.msra.mxu0 %v1861_v52 }
  0x73   :  { %1709 = vmatprep.subr.bf16.mxu0 %v1863_v53  ;;  %v771_v53 = vld [vmem:[%s2475_s1 + $0x8] sm:$0xff] }
  0x76   :  { %1710 = vmatpush3.bf16.msra.mxu0 %v1865_v54 }
  0x77   :  { %1711 = vmatprep.subr.bf16.mxu0 %v1867_v55 }
  0x7a   :  { %1712 = vmatpush3.bf16.msra.mxu0 %v1869_v56 }
  0x7b   :  { %1713 = vmatprep.subr.bf16.mxu0 %v1871_v57  ;;  %v777_v57 = vcombine.high %v771_v53, %v771_v53 }
  0x7e   :  { %1714 = vmatpush3.bf16.msra.mxu0 %v1873_v58 }
  0x7f   :  { %1715 = vmatprep.subr.bf16.mxu0 %v1875_v59 }
  0x82   :  { %1716 = vmatpush3.bf16.msra.mxu0 %v1877_v60 }
  0x83   :  { %1717 = vmatprep.subr.bf16.mxu0 %v1879_v61  ;;  %v1858_v61 = vld [vmem:[%s2480_s6 + $0x80] sm:$0xff]  }
  0x86   :  { %1718 = vmatpush3.bf16.msra.mxu0 %v1881_v62  ;;  %v785_v62 = vpack.c.bf16 %v777_v57, %v777_v57 }
  0x87   :  { %1719 = vmatprep.subr.bf16.mxu0 %v1883_v63 }
  0x8a   :  { %1720 = vmatpush3.bf16.msra.mxu0 %v1885_v1  ;;  %v1862_v1 = vld [vmem:[%s2480_s6 + $0x88] sm:$0xff]  }
  0x8d   :  { %1292 = vmatmul.mubr.bf16.vlgmr.msra.gmra.mrb[20].mxu0 %v786_v4  ;;  %v1868_v4 = vld [vmem:[%s2480_s6 + $0xd8] sm:$0xff]  }
  0xf5   :  { %v1583_v5 = vpop.f32.mrb[0].mxu0 }
  0xf6   :  { %v1584_v7 = vpop.f32.mrb[1].mxu0 }
  0xf7   :  { %v1585_v8 = vadd.f32 %v1584_v7, %v1583_v5  ;;  %v1586_v9 = vpop.f32.mrb[2].mxu0  ;;  %v1611_v10 = vpop.f32.mrb[0].mxu1  ;;  %v1870_v5 = vld [vmem:[%s2480_s6 + $0x98] sm:$0xff]   ;;  %v1874_v7 = vld [vmem:[%s2480_s6 + $0xa0] sm:$0xff]  }
  0xf8   :  { %v1587_v11 = vpop.f32.mrb[3].mxu0  ;;  %v1612_v14 = vpop.f32.mrb[1].mxu1 }
  0xf9   :  { %v502_v12 = vadd.f32 %v1585_v8, %v1451_v6  ;;  %v1588_v13 = vadd.f32 %v1587_v11, %v1586_v9  ;;  %v1613_v15 = vadd.f32 %v1612_v14, %v1611_v10  ;;  %v1614_v16 = vpop.f32.mrb[2].mxu1  ;;  %v1876_v8 = vld [vmem:[%s2480_s6 + $0xe8] sm:$0xff]   ;;  %v1880_v10 = vld [vmem:[%s2480_s6 + $0xf0] sm:$0xff]   ;;  %v784_v14 = vpack.c.bf16 %v771_v53, %v771_v53 }
  0xfa   :  { %v1615_v18 = vpop.f32.mrb[3].mxu1  ;;  %v1878_v9 = vld [vmem:[%s2480_s6 + $0xa8] sm:$0xff]   ;;  %v1882_v11 = vld [vmem:[%s2480_s6 + $0xb0] sm:$0xff]  }
  0xfb   :  { %v505_v17 = vadd.f32 %v1588_v13, %v1451_v6  ;;  %v551_v19 = vadd.f32 %v1613_v15, %v502_v12  ;;  %v1616_v20 = vadd.f32 %v1615_v18, %v1614_v16  ;;  %v1884_v12 = vld [vmem:[%s2480_s6 + $0xf8] sm:$0xff]  }
  0xfc   :  { %v1886_v13 = vld [vmem:[%s2480_s6 + $0xb8] sm:$0xff]  }
  0xfd   :  { %v554_v21 = vadd.f32 %v1616_v20, %v505_v17  ;;  %v1589_v22 = vpop.f32.mrb[4].mxu0  ;;  %v1889_v20 = vld [vmem:[%s2482_s8] sm:$0xff]  }
  0xfe   :  { %v1590_v23 = vpop.f32.mrb[5].mxu0 }
  0xff   :  { %v1591_v24 = vadd.f32 %v1590_v23, %v1589_v22  ;;  %v1592_v25 = vpop.f32.mrb[6].mxu0  ;;  %v1617_v26 = vpop.f32.mrb[4].mxu1  ;;  %v1890_v22 = vld [vmem:[%s2482_s8 + $0x8] sm:$0xff]   ;;  %v1891_v23 = vld [vmem:[%s2482_s8 + $0x10] sm:$0xff]  }
 0x100   :  { %v1593_v27 = vpop.f32.mrb[7].mxu0  ;;  %v1618_v28 = vpop.f32.mrb[5].mxu1 }
 0x101   :  { %v510_v29 = vadd.f32 %v1591_v24, %v1451_v6  ;;  %v1594_v30 = vadd.f32 %v1593_v27, %v1592_v25  ;;  %v1619_v31 = vadd.f32 %v1618_v28, %v1617_v26  ;;  %v1620_v32 = vpop.f32.mrb[6].mxu1  ;;  %v1892_v24 = vld [vmem:[%s2482_s8 + $0x18] sm:$0xff]   ;;  %v1893_v25 = vld [vmem:[%s2482_s8 + $0x20] sm:$0xff]   ;;  %v1894_v26 = vld [vmem:[%s2482_s8 + $0x28] sm:$0xff]  }
 0x102   :  { %v1621_v33 = vpop.f32.mrb[7].mxu1 }
 0x103   :  { %v513_v34 = vadd.f32 %v1594_v30, %v1451_v6  ;;  %v559_v35 = vadd.f32 %v1619_v31, %v510_v29  ;;  %v1622_v36 = vadd.f32 %v1621_v33, %v1620_v32  ;;  %v1872_v6 = vld [vmem:[%s2480_s6 + $0xe0] sm:$0xff]   ;;  %v1895_v32 = vld [vmem:[%s2482_s8 + $0x30] sm:$0xff]   ;;  %v1896_v33 = vld [vmem:[%s2482_s8 + $0x38] sm:$0xff]  }
 0x105   :  { %v562_v37 = vadd.f32 %v1622_v36, %v513_v34  ;;  %v1500_v34 = vld [vmem:[%s2479_s5] ss:$0 sm:$0xff] }
 0x115   :  { %v1639_v38 = vpop.f32.mrb[8].mxu0 }
 0x116   :  { %v1640_v39 = vpop.f32.mrb[9].mxu0 }
 0x117   :  { %v1641_v40 = vadd.f32 %v1640_v39, %v1639_v38  ;;  %v1642_v41 = vpop.f32.mrb[10].mxu0 }
 0x118   :  { %v1643_v42 = vpop.f32.mrb[11].mxu0 }
 0x119   :  { %v600_v43 = vadd.f32 %v1641_v40, %v551_v19  ;;  %v1644_v44 = vadd.f32 %v1643_v42, %v1642_v41 }
 0x11b   :  { %v603_v45 = vadd.f32 %v1644_v44, %v554_v21  ;;  %v614_v46 = vmax.f32 %v600_v43, 0.0  ;;  %v1955_v21 = vmov 0.0  }
 0x11d   :  { %v615_v47 = vmax.f32 %v603_v45, 0.0  ;;  %v1645_v48 = vpop.f32.mrb[12].mxu0 }
 0x11e   :  { %v1646_v49 = vpop.f32.mrb[13].mxu0 }
 0x11f   :  { %v1647_v50 = vadd.f32 %v1646_v49, %v1645_v48  ;;  %v1648_v51 = vpop.f32.mrb[14].mxu0  ;;  %v618_v52 = vpack.c.bf16 %v615_v47, %v614_v46  ;;  %v1509_v48 = vld [vmem:[%s2481_s7] ss:$0 sm:$0xff] }
 0x120   :  { %v1649_v54 = vpop.f32.mrb[15].mxu0 }
 0x121   :  { %v608_v55 = vadd.f32 %v1647_v50, %v559_v35  ;;  %v1650_v56 = vadd.f32 %v1649_v54, %v1648_v51  ;;  %1752 = vmatprep.mubr.bf16.mxu1 %v618_v52 }
 0x123   :  { %v611_v58 = vadd.f32 %v1650_v56, %v562_v37  ;;  %v616_v59 = vmax.f32 %v608_v55, 0.0 }
 0x125   :  { %v617_v60 = vmax.f32 %v611_v58, 0.0 }
 0x127   :  { %v619_v63 = vpack.c.bf16 %v617_v60, %v616_v59 }
 0x129   :  { %1753 = vmatmul.mubr.bf16.vlgmr.msra.gmra.mrb[8].mxu1 %v619_v63 }
 0x12a   :  { %1684 = vmatpush3.bf16.msra.mxu1 %v1858_v61  ;;  %1251 = vmatprep.mubr.bf16.mxu1 %v785_v62 }
 0x12b   :  { %1685 = vmatprep.subr.bf16.mxu1 %v1860_v0 }
 0x12e   :  { %1686 = vmatpush3.bf16.msra.mxu1 %v1862_v1 }
 0x12f   :  { %1687 = vmatprep.subr.bf16.mxu1 %v1864_v2 }
 0x132   :  { %1688 = vmatpush3.bf16.msra.mxu1 %v1866_v3 }
 0x133   :  { %1689 = vmatprep.subr.bf16.mxu1 %v1868_v4 }
 0x136   :  { %1690 = vmatpush3.bf16.msra.mxu1 %v1870_v5 }
 0x137   :  { %1691 = vmatprep.subr.bf16.mxu1 %v1872_v6 }
 0x13a   :  { %1692 = vmatpush3.bf16.msra.mxu1 %v1874_v7 }
 0x13b   :  { %1693 = vmatprep.subr.bf16.mxu1 %v1876_v8 }
 0x13e   :  { %1694 = vmatpush3.bf16.msra.mxu1 %v1878_v9 }
 0x13f   :  { %1695 = vmatprep.subr.bf16.mxu1 %v1880_v10 }
 0x140   :  { %v1677_v15 = vpop.f32.mrb[16].mxu0 }
 0x141   :  { %v1678_v16 = vpop.f32.mrb[17].mxu0 }
 0x142   :  { %1696 = vmatpush3.bf16.msra.mxu1 %v1882_v11  ;;  %v1679_v17 = vadd.f32 %v1678_v16, %v1677_v15  ;;  %v1680_v18 = vpop.f32.mrb[18].mxu0  ;;  %v1558_v11 = vld [vmem:[%s2483_s9] ss:$0 sm:$0xff] }
 0x143   :  { %1697 = vmatprep.subr.bf16.mxu1 %v1884_v12  ;;  %v1681_v19 = vpop.f32.mrb[19].mxu0 }
 0x144   :  { %v1214_v51 = vadd.f32 %v1679_v17, %v1509_v48 }
 0x146   :  { %1698 = vmatpush3.bf16.msra.mxu1 %v1886_v13 }
 0x147   :  { %1756 = vmatprep.subr.bf16.mxu1 %v1955_v21 }
 0x149   :  { %1252 = vmatmul.mubr.bf16.vlgmr.msra.gmra.mrb[12].mxu1 %v784_v14 }
 0x14a   :  { %1757 = vmatpush3.bf16.msra.mxu1 %v1889_v20  ;;  %1772 = vmatprep.mubr.msk.bf16.mxu1 %vm1956_vm0, %v1955_v21 }
 0x14b   :  { %1758 = vmatprep.subr.bf16.mxu1 %v1955_v21 }
 0x14e   :  { %1759 = vmatpush3.bf16.msra.mxu1 %v1890_v22 }
 0x14f   :  { %1760 = vmatprep.subr.bf16.mxu1 %v1955_v21 }
 0x152   :  { %1761 = vmatpush3.bf16.msra.mxu1 %v1891_v23 }
 0x153   :  { %1762 = vmatprep.subr.bf16.mxu1 %v1955_v21 }
 0x156   :  { %1763 = vmatpush3.bf16.msra.mxu1 %v1892_v24 }
 0x157   :  { %1764 = vmatprep.subr.bf16.mxu1 %v1955_v21 }
 0x15a   :  { %1765 = vmatpush3.bf16.msra.mxu1 %v1893_v25 }
 0x15b   :  { %1766 = vmatprep.subr.bf16.mxu1 %v1955_v21 }
 0x15e   :  { %1767 = vmatpush3.bf16.msra.mxu1 %v1894_v26 }
 0x15f   :  { %1768 = vmatprep.subr.bf16.mxu1 %v1955_v21 }
 0x160   :  { %v1721_v27 = vpop.f32.mrb[20].mxu0 }
 0x161   :  { %v1722_v28 = vpop.f32.mrb[21].mxu0 }
 0x162   :  { %v1723_v29 = vadd.f32 %v1722_v28, %v1721_v27  ;;  %v1724_v30 = vpop.f32.mrb[22].mxu0  ;;  %1769 = vmatpush3.bf16.msra.mxu1 %v1895_v32 }
 0x163   :  { %v1725_v31 = vpop.f32.mrb[23].mxu0  ;;  %1770 = vmatprep.subr.bf16.mxu1 %v1955_v21 }
 0x166   :  { %1771 = vmatpush3.bf16.msra.mxu1 %v1896_v33 }
 0x1fc   :  { %v1754_v35 = vpop.f32.mrb[8].mxu1 }
 0x1fd   :  { %v734_v36 = vadd.f32 %v1754_v35, %v1500_v34  ;;  %v725_v37 = vpop.f32.mrb[9].mxu1 }
 0x1fe   :  { %v726_v38 = vadd.f32 %v1500_v34, %v725_v37  ;;  %v1755_v39 = vpop.f32.mrb[10].mxu1 }
 0x1ff   :  { %v737_v40 = vadd.f32 %v1755_v39, %v1500_v34  ;;  %v728_v41 = vpop.f32.mrb[11].mxu1  ;;  %v742_v42 = vmul.f32 %v734_v36, %v734_v36 }
 0x200   :  { %v729_v43 = vadd.f32 %v1500_v34, %v728_v41  ;;  %v740_v44 = vmul.f32 %v726_v38, %v726_v38 }
 0x201   :  { %748 = vadd.xlane.f32.xlu1 %v742_v42  ;;  %v743_v45 = vmul.f32 %v737_v40, %v737_v40 }
 0x202   :  { %744 = vadd.xlane.f32.xlu0 %v740_v44  ;;  %v741_v47 = vmul.f32 %v729_v43, %v729_v43 }
 0x203   :  { %v751_v46 = vsel %vm750_vm1, %v743_v45, 0.0 }
 0x205   :  { %752 = vadd.xlane.f32.xlu1 %v751_v46 }
 0x206   :  { %746 = vadd.xlane.f32.xlu0 %v741_v47 }
 0x21c   :  { %v1699_v49 = vpop.f32.mrb[12].mxu1 }
 0x21d   :  { %v1700_v50 = vpop.f32.mrb[13].mxu1 }
 0x21e   :  { %v1701_v52 = vadd.f32 %v1700_v50, %v1699_v49  ;;  %v1702_v53 = vpop.f32.mrb[14].mxu1 }
 0x21f   :  { %v1703_v54 = vpop.f32.mrb[15].mxu1 }
 0x220   :  { %v1254_v55 = vadd.f32 %v1701_v52, %v1214_v51 }
 0x222   :  { %v1294_v56 = vadd.f32 %v1723_v29, %v1254_v55 }
 0x224   :  { %v1299_v57 = vmax.f32 %v1294_v56, 0.0 }
 0x226   :  { %v1300_v58 = vpack.c.bf16 %v1299_v57, %v1299_v57 }
 0x228   :  { %1773 = vmatmul.mubr.bf16.vlgmr.msra.gmra.mrb[16].mxu1 %v1300_v58 }
 0x28e   :  { %v749_v59 = vpop.xlane.xlu1 %748 }
 0x28f   :  { %v756_v60 = vadd.f32 1e-12, %v749_v59  ;;  %v745_v61 = vpop.xlane.xlu0 %744 }
 0x290   :  { %v754_v62 = vadd.f32 1e-12, %v745_v61 }
 0x291   :  { %1897 = vrsqrt.f32 %v756_v60 }
 0x292   :  { %1899 = vrsqrt.f32 %v754_v62  ;;  %v753_v63 = vpop.xlane.xlu1 %752 }
 0x293   :  { %v757_v0 = vadd.f32 1e-12, %v753_v63  ;;  %v747_v1 = vpop.xlane.xlu0 %746 }
 0x294   :  { %v755_v2 = vadd.f32 1e-12, %v747_v1 }
 0x295   :  { %1901 = vrsqrt.f32 %v757_v0 }
 0x296   :  { %1903 = vrsqrt.f32 %v755_v2 }
 0x29b   :  { %v1898_v3 = vpop.eup %1897 }
 0x29c   :  { %v1900_v4 = vpop.eup %1899  ;;  %v764_v5 = vmul.f32 %v1898_v3, %v734_v36 }
 0x29d   :  { %v762_v6 = vmul.f32 %v1900_v4, %v726_v38 }
 0x29e   :  { %768 = vst [vmem:[#allocation2 + $0x10] sm:$0xff] %v764_v5 }
 0x29f   :  { %v1902_v7 = vpop.eup %1901  ;;  %766 = vst [vmem:[#allocation2] sm:$0xff] %v762_v6 }
 0x2a0   :  { %v1904_v8 = vpop.eup %1903  ;;  %v765_v9 = vmul.f32 %v1902_v7, %v737_v40 }
 0x2a1   :  { %v763_v10 = vmul.f32 %v1904_v8, %v729_v43 }
 0x2a2   :  { %769 = vst [vmem:[#allocation2 + $0x18] sm:$0x1] %v765_v9 }
 0x2a3   :  { %767 = vst [vmem:[#allocation2 + $0x8] sm:$0xff] %v763_v10 }
 0x2fb   :  { %v1406_v12 = vpop.f32.mrb[16].mxu1 }
 0x2fc   :  { %v1407_v13 = vadd.f32 %v1558_v11, %v1406_v12  ;;  %v1774_v14 = vpop.f32.mrb[17].mxu1 }
 0x2fd   :  { %v1409_v15 = vpop.f32.mrb[18].mxu1 }
 0x2fe   :  { %v1775_v16 = vpop.f32.mrb[19].mxu1  ;;  %v1412_v17 = vmul.f32 %v1407_v13, %v1407_v13 }
 0x300   :  { %v1414_v18 = vsel %vm1413_vm2, %v1412_v17, 0.0 }
 0x301   :  { %1415 = vadd.xlane.f32.xlu0 %v1414_v18 }
 0x302   :  { %1918 = shalt.err (!%p1915_p4)
}
 0x303   :  { %s1919_s1 = scalar_lea.hbm %s2484_s10, 512 }
 0x304   :  { %p1920_p5 = scmp.ne.s32.totalorder %s2484_s10, %s1919_s1  ;;  %p1923_p6 = scmp.lt.u32.totalorder %s1919_s1, %s2484_s10 }
 0x306   :  { %p1925_p7 = pnand %p1923_p6, %p1920_p5 }
 0x308   :  { %1928 = shalt.err (!%p1925_p7)
}
 0x309   :  { %s1958_s17 = smov 128   ;;  %s1959_s6 = smov 8  }
 0x30a   :  { %1432 = dma.vmem_to_hbm [thread:$0]  %s1427_s12, 512, %s2484_s10, [#allocation3], %s1958_s17, %s1958_s17, %s1959_s6  }
 0x30b   :  { %s1960_s20 = smov [#allocation4]  }
 0x30c   :  { %s1439_s21 = sshll.u32 %s1960_s20, 4  ;;  %s1440_s21 = int_to_ptr.vmem [resolvable:$true] %s1439_s21 }
 0x30d   :  { %s1929_s22 = scalar_lea.vmem %s1440_s21, 64  ;;  %p1934_p9 = scmp.lt.s32.totalorder %s1440_s21, %s1440_s21 }
 0x30e   :  { %p1930_p8 = scmp.ne.s32.totalorder %s1440_s21, %s1929_s22  ;;  %p1935_p10 = scmp.lt.s32.totalorder %s1929_s22, %s1929_s22 }
 0x310   :  { %p1936_p11 = por %p1935_p10, %p1934_p9 }
 0x312   :  { %p1937_p12 = pnand %p1936_p11, %p1930_p8 }
 0x38e   :  { %v1416_v19 = vpop.xlane.xlu0 %1415 }
 0x38f   :  { %v1417_v20 = vadd.f32 1e-12, %v1416_v19 }
 0x391   :  { %1905 = vrsqrt.f32 %v1417_v20 }
 0x39b   :  { %v1906_v21 = vpop.eup %1905 }
 0x39c   :  { %v1419_v22 = vmul.f32 %v1906_v21, %v1407_v13 }
 0x39e   :  { %1420 = vst [vmem:[#allocation4] sm:$0xf] %v1419_v22 }
 0x39f   :  { %1940 = shalt.err (!%p1937_p12)
}
 0x3a0   :  { %s1941_s10 = scalar_lea.hbm %s2485_s11, 64 }
 0x3a1   :  { %p1942_p13 = scmp.ne.s32.totalorder %s2485_s11, %s1941_s10  ;;  %p1945_p0 = scmp.lt.u32.totalorder %s1941_s10, %s2485_s11 }
 0x3a3   :  { %p1947_p1 = pnand %p1945_p0, %p1942_p13 }
 0x3a5   :  { %1950 = shalt.err (!%p1947_p1)
}
 0x3a6   :  { %1442 = dma.vmem_to_hbm [thread:$0]  %s1440_s21, 64, %s2485_s11, [#allocation5]  }
 0x3a7   :  { %1951 = dma.done.wait [#allocation3], 512  }
 0x3a8   :  { %1952 = vsyncadd [#allocation3], 4294966784 }
 0x3a9   :  { %1953 = dma.done.wait [#allocation5], 64  }
 0x3aa   :  { %1954 = vsyncadd [#allocation5], 4294967232 }
 0x3ab   :  { %1449 = vsyncpa [#allocation3], 1 }
 0x3ac   :  { %1450 = vsyncpa [#allocation5], 1 }

</bundles_post_ra>
